<compile_context>
chip_gen: v5e
topology: v5e:2x2
jax: 0.10.0
libtpu: 0.0.40
codegen_flags: <defaults>
</compile_context>

<pallas_src>
import functools

import jax
import jax.numpy as jnp
from jax.experimental import pallas as pl
from jax.experimental.pallas import tpu as pltpu

_LANE = 128


def _round_up(x, m):
    return ((x + m - 1) // m) * m


def _round_down(x, m):
    return (x // m) * m


def _weighted_attention_kernel(x_ref, w_ref,
                               out_ref, fb_ref, fa_ref, cw_ref,
                               *, inv_b, true_b, tile_b, mask_rows):
    """Grid = (hidden_tiles, batch_tiles); batch is the inner (reduction) axis."""
    b_idx = pl.program_id(1)

    @pl.when(b_idx == 0)
    def _init():
        # sigmoid once per hidden tile (EUP), written straight into the
        # resident current_weights output block; reused as the gate below.
        cw_ref[...] = jax.nn.sigmoid(w_ref[...].astype(jnp.float32))
        fb_ref[...] = jnp.zeros_like(fb_ref)

    w = cw_ref[...]                                  # (1, TH) f32 gate
    x = x_ref[...]                                   # (TB, TH) input dtype

    # weighted_x store path stays in the input dtype (bf16 mul on v6e/v7x).
    if jnp.dtype(x_ref.dtype) == jnp.dtype(jnp.float32):
        gate = w
    else:
        gate = w.astype(x_ref.dtype)
    out_ref[...] = (x * gate).astype(out_ref.dtype)

    # Batch-sum accumulation in f32 directly into the resident fb output block.
    # Garbage rows of a ragged last batch tile are masked out; garbage columns
    # of a ragged hidden tile never reach HBM (Pallas masks partial stores).
    x_f32 = x.astype(jnp.float32)
    if mask_rows:
        row = jax.lax.broadcasted_iota(jnp.int32, (tile_b, 1), 0)
        valid = (b_idx * tile_b + row) < true_b
        x_f32 = jnp.where(valid, x_f32, 0.0)
    fb_ref[...] += jnp.sum(x_f32, axis=0, keepdims=True)

    @pl.when(b_idx == pl.num_programs(1) - 1)
    def _finalize():
        fb = fb_ref[...] * inv_b
        fb_ref[...] = fb
        fa_ref[...] = w * fb        # mean(x*w) == w*mean(x): w is per-column


def weighted_attention_layer(x, attn_weight, *, tb_max=512, th_max=None):
    """Pallas implementation of WeightedAttentionLayer.forward.

    Args:
      x:           [batch, hidden_dim]
      attn_weight: [hidden_dim] raw (pre-sigmoid) parameter

    Returns:
      weighted_x:      [batch, hidden_dim]  (same dtype as x)
      feature_before:  [hidden_dim] f32     mean of x over batch
      feature_after:   [hidden_dim] f32     mean of weighted_x over batch
      current_weights: [hidden_dim] f32     sigmoid(attn_weight)
    """
    b, h = x.shape
    out_dtype = x.dtype
    itemsize = jnp.dtype(x.dtype).itemsize

    if th_max is None:
        th_max = 2048 if itemsize <= 2 else 1024

    # Hidden tile: must be a multiple of 128 or the full hidden dim. Prefer
    # >= 2 lane-dense tiles when h allows it (v7x megacore), else full width.
    if h % _LANE == 0 and h >= 2 * _LANE:
        th = min(th_max, _round_up(pl.cdiv(h, 2), _LANE))
    else:
        th = h
    grid_h = pl.cdiv(h, th)

    # Batch tile: sublane-aligned (dtype-aware) streaming chunk, capped so
    # 2x(in+out) double-buffered blocks stay ~<= 12 MiB (fits every chip's
    # default scoped VMEM). If the whole batch fits one tile, take it whole.
    sublane = max(8, 32 // itemsize)                  # 8 f32, 16 bf16, 32 int8
    per_block_budget = 3 * 1024 * 1024                # bytes per streamed block
    rows_fit = max(sublane, per_block_budget // max(1, th * itemsize))
    tb_cap = max(sublane, _round_down(min(tb_max, rows_fit), sublane))
    tb = b if b <= tb_cap else tb_cap
    grid_b = pl.cdiv(b, tb)
    mask_rows = (b % tb) != 0

    w2d = attn_weight.reshape(1, h)

    kernel = functools.partial(
        _weighted_attention_kernel,
        inv_b=float(1.0 / b), true_b=b, tile_b=tb, mask_rows=mask_rows)

    out_shapes = (
        jax.ShapeDtypeStruct((b, h), out_dtype),      # weighted_x
        jax.ShapeDtypeStruct((1, h), jnp.float32),    # feature_before
        jax.ShapeDtypeStruct((1, h), jnp.float32),    # feature_after
        jax.ShapeDtypeStruct((1, h), jnp.float32),    # current_weights
    )

    cost = pl.CostEstimate(
        flops=2 * b * h,                              # gate multiply + sum add
        transcendentals=h,                            # sigmoid
        bytes_accessed=2 * b * h * itemsize + h * itemsize + 3 * h * 4,
    )

    weighted, fb, fa, cw = pl.pallas_call(
        kernel,
        out_shape=out_shapes,
        grid_spec=pltpu.PrefetchScalarGridSpec(
            num_scalar_prefetch=0,
            grid=(grid_h, grid_b),
            in_specs=[
                pl.BlockSpec((tb, th), lambda hi, bi: (bi, hi)),   # x
                pl.BlockSpec((1, th), lambda hi, bi: (0, hi)),     # attn_weight
            ],
            out_specs=[
                pl.BlockSpec((tb, th), lambda hi, bi: (bi, hi)),   # weighted_x
                pl.BlockSpec((1, th), lambda hi, bi: (0, hi)),     # feature_before
                pl.BlockSpec((1, th), lambda hi, bi: (0, hi)),     # feature_after
                pl.BlockSpec((1, th), lambda hi, bi: (0, hi)),     # current_weights
            ],
        ),
        compiler_params=pltpu.CompilerParams(
            dimension_semantics=("parallel", "arbitrary")),
        cost_estimate=cost,
    )(x, w2d)

    return weighted, fb[0], fa[0], cw[0]


def _reference(x, attn_weight):
    w = jax.nn.sigmoid(attn_weight)
    wx = x * w
    return wx, x.mean(axis=0), wx.mean(axis=0), w


if __name__ == "__main__":
    key = jax.random.PRNGKey(0)
    k_x, k_w, k_x2, k_w2 = jax.random.split(key, 4)

    # Primary small case matching the module (batch, hidden_dim).
    batch, hidden_dim = 8, 32
    x = jax.random.normal(k_x, (batch, hidden_dim), dtype=jnp.float32)
    attn_weight = jax.random.normal(k_w, (hidden_dim,), dtype=jnp.float32)

    weighted_x, feat_before, feat_after, cur_w = jax.block_until_ready(
        weighted_attention_layer(x, attn_weight))

    ref_wx, ref_fb, ref_fa, ref_w = _reference(x, attn_weight)
    assert jnp.allclose(weighted_x, ref_wx, atol=1e-5)
    assert jnp.allclose(feat_before, ref_fb, atol=1e-5)
    assert jnp.allclose(feat_after, ref_fa, atol=1e-5)
    assert jnp.allclose(cur_w, ref_w, atol=1e-5)

    # Second tiny case exercising hidden tiling + ragged (masked) batch tile.
    b2, h2 = 37, 256
    x2 = jax.random.normal(k_x2, (b2, h2), dtype=jnp.float32)
    w2 = jax.random.normal(k_w2, (h2,), dtype=jnp.float32)
    wx2, fb2, fa2, cw2 = jax.block_until_ready(
        weighted_attention_layer(x2, w2, tb_max=32))
    rwx2, rfb2, rfa2, rw2 = _reference(x2, w2)
    assert jnp.allclose(wx2, rwx2, atol=1e-5)
    assert jnp.allclose(fb2, rfb2, atol=1e-5)
    assert jnp.allclose(fa2, rfa2, atol=1e-5)
    assert jnp.allclose(cw2, rw2, atol=1e-5)

    print("KERNEL_OK")
</pallas_src>

<mosaic_0001>
module attributes {stable_mosaic.version = 11 : i64} {
  func.func @_weighted_attention_kernel(%arg0: i32, %arg1: i32, %arg2: memref<8x32xf32, #tpu.memory_space<vmem>>, %arg3: memref<1x32xf32, #tpu.memory_space<vmem>>, %arg4: memref<8x32xf32, #tpu.memory_space<vmem>>, %arg5: memref<1x32xf32, #tpu.memory_space<vmem>>, %arg6: memref<1x32xf32, #tpu.memory_space<vmem>>, %arg7: memref<1x32xf32, #tpu.memory_space<vmem>>) attributes {dimension_semantics = [#tpu.dimension_semantics<parallel>, #tpu.dimension_semantics<arbitrary>], iteration_bounds = array<i64: 1, 1>, scalar_prefetch = 0 : i64, scratch_operands = 0 : i64, tpu.core_type = #tpu.core_type<tc>, window_params = [{transform_indices = @transform_0, window_bounds = array<i64: 8, 32>}, {transform_indices = @transform_1, window_bounds = array<i64: 1, 32>}, {transform_indices = @transform_2, window_bounds = array<i64: 8, 32>}, {transform_indices = @transform_3, window_bounds = array<i64: 1, 32>}, {transform_indices = @transform_4, window_bounds = array<i64: 1, 32>}, {transform_indices = @transform_5, window_bounds = array<i64: 1, 32>}]} {
    %c0_i32 = arith.constant 0 : i32
    %0 = arith.cmpi eq, %arg1, %c0_i32 : i32
    %1 = arith.extui %0 : i1 to i32
    %c0_i32_0 = arith.constant 0 : i32
    %2 = arith.cmpi ne, %1, %c0_i32_0 : i32
    scf.if %2 {
      %c0_12 = arith.constant 0 : index
      %c0_13 = arith.constant 0 : index
      %16 = vector.load %arg3[%c0_12, %c0_13] : memref<1x32xf32, #tpu.memory_space<vmem>>, vector<1x32xf32>
      %17 = arith.negf %16 : vector<1x32xf32>
      %18 = math.exp %17 : vector<1x32xf32>
      %cst_14 = arith.constant 1.000000e+00 : f32
      %19 = vector.broadcast %cst_14 : f32 to vector<1x32xf32>
      %20 = arith.addf %19, %18 : vector<1x32xf32>
      %21 = arith.divf %19, %20 : vector<1x32xf32>
      %c0_15 = arith.constant 0 : index
      %c0_16 = arith.constant 0 : index
      %22 = vector.load %arg7[%c0_15, %c0_16] : memref<1x32xf32, #tpu.memory_space<vmem>>, vector<1x32xf32>
      tpu.vector_store %arg7[%c0_15, %c0_16], %21 {strides = array<i32>} : memref<1x32xf32, #tpu.memory_space<vmem>>, vector<1x32xf32>,
      %cst_17 = arith.constant 0.000000e+00 : f32
      %23 = vector.broadcast %cst_17 : f32 to vector<1x32xf32>
      %c0_18 = arith.constant 0 : index
      %c0_19 = arith.constant 0 : index
      %24 = vector.load %arg5[%c0_18, %c0_19] : memref<1x32xf32, #tpu.memory_space<vmem>>, vector<1x32xf32>
      tpu.vector_store %arg5[%c0_18, %c0_19], %23 {strides = array<i32>} : memref<1x32xf32, #tpu.memory_space<vmem>>, vector<1x32xf32>,
    } else {
    }
    %c0 = arith.constant 0 : index
    %c0_1 = arith.constant 0 : index
    %3 = vector.load %arg7[%c0, %c0_1] : memref<1x32xf32, #tpu.memory_space<vmem>>, vector<1x32xf32>
    %c0_2 = arith.constant 0 : index
    %c0_3 = arith.constant 0 : index
    %4 = vector.load %arg2[%c0_2, %c0_3] : memref<8x32xf32, #tpu.memory_space<vmem>>, vector<8x32xf32>
    %5 = vector.broadcast %3 : vector<1x32xf32> to vector<8x32xf32>
    %6 = arith.mulf %4, %5 : vector<8x32xf32>
    %c0_4 = arith.constant 0 : index
    %c0_5 = arith.constant 0 : index
    %7 = vector.load %arg4[%c0_4, %c0_5] : memref<8x32xf32, #tpu.memory_space<vmem>>, vector<8x32xf32>
    tpu.vector_store %arg4[%c0_4, %c0_5], %6 {strides = array<i32>} : memref<8x32xf32, #tpu.memory_space<vmem>>, vector<8x32xf32>,
    %c0_6 = arith.constant 0 : index
    %c0_7 = arith.constant 0 : index
    %8 = vector.load %arg5[%c0_6, %c0_7] : memref<1x32xf32, #tpu.memory_space<vmem>>, vector<1x32xf32>
    %cst = arith.constant dense<0.000000e+00> : vector<32xf32>
    %9 = vector.multi_reduction <add>, %4, %cst [0] : vector<8x32xf32> to vector<32xf32>
    %10 = vector.shape_cast %9 : vector<32xf32> to vector<1x32xf32>
    %11 = arith.addf %8, %10 : vector<1x32xf32>
    %c0_8 = arith.constant 0 : index
    %c0_9 = arith.constant 0 : index
    %12 = vector.load %arg5[%c0_8, %c0_9] : memref<1x32xf32, #tpu.memory_space<vmem>>, vector<1x32xf32>
    tpu.vector_store %arg5[%c0_8, %c0_9], %11 {strides = array<i32>} : memref<1x32xf32, #tpu.memory_space<vmem>>, vector<1x32xf32>,
    %c0_i32_10 = arith.constant 0 : i32
    %13 = arith.cmpi eq, %arg1, %c0_i32_10 : i32
    %14 = arith.extui %13 : i1 to i32
    %c0_i32_11 = arith.constant 0 : i32
    %15 = arith.cmpi ne, %14, %c0_i32_11 : i32
    scf.if %15 {
      %c0_12 = arith.constant 0 : index
      %c0_13 = arith.constant 0 : index
      %16 = vector.load %arg5[%c0_12, %c0_13] : memref<1x32xf32, #tpu.memory_space<vmem>>, vector<1x32xf32>
      %cst_14 = arith.constant 1.250000e-01 : f32
      %17 = vector.broadcast %cst_14 : f32 to vector<1x32xf32>
      %18 = arith.mulf %16, %17 : vector<1x32xf32>
      %c0_15 = arith.constant 0 : index
      %c0_16 = arith.constant 0 : index
      %19 = vector.load %arg5[%c0_15, %c0_16] : memref<1x32xf32, #tpu.memory_space<vmem>>, vector<1x32xf32>
      tpu.vector_store %arg5[%c0_15, %c0_16], %18 {strides = array<i32>} : memref<1x32xf32, #tpu.memory_space<vmem>>, vector<1x32xf32>,
      %20 = arith.mulf %3, %18 : vector<1x32xf32>
      %c0_17 = arith.constant 0 : index
      %c0_18 = arith.constant 0 : index
      %21 = vector.load %arg6[%c0_17, %c0_18] : memref<1x32xf32, #tpu.memory_space<vmem>>, vector<1x32xf32>
      tpu.vector_store %arg6[%c0_17, %c0_18], %20 {strides = array<i32>} : memref<1x32xf32, #tpu.memory_space<vmem>>, vector<1x32xf32>,
    } else {
    }
    return
  }
  func.func @transform_0(%arg0: i32, %arg1: i32) -> (i32, i32) {
    %c0_i32 = arith.constant 0 : i32
    return %arg1, %arg0 : i32, i32
  }
  func.func @transform_1(%arg0: i32, %arg1: i32) -> (i32, i32) {
    %c0_i32 = arith.constant 0 : i32
    %c0_i32_0 = arith.constant 0 : i32
    return %c0_i32, %arg0 : i32, i32
  }
  func.func @transform_2(%arg0: i32, %arg1: i32) -> (i32, i32) {
    %c0_i32 = arith.constant 0 : i32
    return %arg1, %arg0 : i32, i32
  }
  func.func @transform_3(%arg0: i32, %arg1: i32) -> (i32, i32) {
    %c0_i32 = arith.constant 0 : i32
    %c0_i32_0 = arith.constant 0 : i32
    return %c0_i32, %arg0 : i32, i32
  }
  func.func @transform_4(%arg0: i32, %arg1: i32) -> (i32, i32) {
    %c0_i32 = arith.constant 0 : i32
    %c0_i32_0 = arith.constant 0 : i32
    return %c0_i32, %arg0 : i32, i32
  }
  func.func @transform_5(%arg0: i32, %arg1: i32) -> (i32, i32) {
    %c0_i32 = arith.constant 0 : i32
    %c0_i32_0 = arith.constant 0 : i32
    return %c0_i32, %arg0 : i32, i32
  }
}

</mosaic_0001>

<bundles_post_ra>
// kernel: tpu_custom_call.1
= control target key start
LH: loop header
LB: loop body
LE: loop exit
PB: predicated region body
PF: predicated region fallthrough
CT: control target
= control target key end

     0   :  { %11 = vsyncpa [#allocation3], 0  ;;  %s393_s0 = inlined_call_operand.hbm [shape: f32[8,32], index: 0, kind: input, shape index: {}]   ;;  %s394_s1 = inlined_call_operand.hbm [shape: f32[1,32], index: 1, kind: input, shape index: {}]   ;;  %s395_s2 = inlined_call_operand.hbm [shape: f32[8,32], index: 2, kind: output, shape index: {0}]   ;;  %s396_s3 = inlined_call_operand.hbm [shape: f32[1,32], index: 3, kind: output, shape index: {1}]   ;;  %s397_s4 = inlined_call_operand.hbm [shape: f32[1,32], index: 4, kind: output, shape index: {2}]   ;;  %s398_s5 = inlined_call_operand.hbm [shape: f32[1,32], index: 5, kind: output, shape index: {3}]  }
   0x1   :  { %12 = vsyncpa [#allocation6], 0 }
   0x2   :  { %13 = vsyncpa [#allocation4], 0 }
   0x3   :  { %14 = vsyncpa [#allocation9], 0 }
   0x4   :  { %15 = vsyncpa [#allocation12], 0  ;;  %s21_s20 = sshll.u32 %s393_s0, 4  ;;  %s331_s21 = smov [#allocation2]   ;;  %s22_s20 = int_to_ptr.hbm [resolvable:$true] %s21_s20 }
   0x5   :  { %s23_s22 = sshll.u32 %s331_s21, 4  ;;  %s32_s25 = sshll.u32 %s394_s1, 4  ;;  %s24_s22 = int_to_ptr.vmem [resolvable:$true] %s23_s22  ;;  %s33_s25 = int_to_ptr.hbm [resolvable:$true] %s32_s25 }
   0x6   :  { %26 = dma.hbm_to_vmem [thread:$0]  %s22_s20, 128, %s24_s22, [#allocation3]  }
   0x7   :  { %s332_s26 = smov [#allocation5]  }
   0x8   :  { %s34_s27 = sshll.u32 %s332_s26, 4  ;;  %s35_s27 = int_to_ptr.vmem [resolvable:$true] %s34_s27 }
   0x9   :  { %37 = dma.hbm_to_vmem [thread:$0]  %s33_s25, 16, %s35_s27, [#allocation6]  }
   0xa   :  { %321 = dma.done.wait [#allocation3], 128  }
   0xb   :  { %322 = vsyncadd [#allocation3], 4294967168 }
   0xc   :  { %323 = dma.done.wait [#allocation6], 16  }
   0xd   :  { %324 = vsyncadd [#allocation6], 4294967280  ;;  %vm70_vm0 = vcmask 253952   ;;  %v333_v0 = vmov 0.0   ;;  %vm79_vm1 = vcmask 261120   ;;  %v74_v1 = vld [vmem:[#allocation2] sm:$0xff] }
   0xe   :  { %72 = vst.msk [vmem:[#allocation8] sm:$0x1] %vm70_vm0, %v333_v0  ;;  %v50_v2 = vld [vmem:[#allocation5] sm:$0x1]  ;;  %v82_v3 = vsel %vm79_vm1, %v74_v1, 0.0  ;;  %s334_s0 = smov [#allocation8]  }
   0xf   :  { %v165_v4 = vmul.f32 -1.442695, %v50_v2  ;;  %v83_v5 = vrot.slane %v82_v3, 4  ;;  %s116_s1 = sshll.u32 %s334_s0, 4  ;;  %s118_s30 = sshll.u32 %s396_s3, 4  ;;  %s117_s1 = int_to_ptr.vmem [resolvable:$true] %s116_s1  ;;  %s119_s30 = int_to_ptr.hbm [resolvable:$true] %s118_s30 }
  0x10   :  { %s335_s6 = smov [#allocation11]   ;;  %s140_s10 = sshll.u32 %s398_s5, 4  ;;  %s141_s10 = int_to_ptr.hbm [resolvable:$true] %s140_s10 }
  0x11   :  { %173 = vpow2.f32 %v165_v4  ;;  %v84_v6 = vadd.f32 %v83_v5, %v82_v3  ;;  %s138_s7 = sshll.u32 %s335_s6, 4  ;;  %s336_s3 = smov [#allocation10]   ;;  %s139_s7 = int_to_ptr.vmem [resolvable:$true] %s138_s7 }
  0x12   :  { %s127_s11 = sshll.u32 %s336_s3, 4  ;;  %s129_s13 = sshll.u32 %s397_s4, 4  ;;  %s128_s11 = int_to_ptr.vmem [resolvable:$true] %s127_s11  ;;  %s130_s13 = int_to_ptr.hbm [resolvable:$true] %s129_s13 }
  0x13   :  { %v85_v7 = vrot.slane %v84_v6, 2  ;;  %s337_s14 = smov [#allocation7]   ;;  %s107_s18 = sshll.u32 %s395_s2, 4  ;;  %s108_s18 = int_to_ptr.hbm [resolvable:$true] %s107_s18 }
  0x14   :  { %s105_s15 = sshll.u32 %s337_s14, 4  ;;  %s106_s15 = int_to_ptr.vmem [resolvable:$true] %s105_s15 }
  0x15   :  { %v86_v8 = vadd.f32 %v85_v7, %v84_v6  ;;  %v81_v12 = vld [vmem:[#allocation8] sm:$0x1] }
  0x17   :  { %v174_v9 = vpop.eup %173  ;;  %v87_v10 = vrot.slane %v86_v8, 1 }
  0x18   :  { %v54_v11 = vadd.f32 1.0, %v174_v9 }
  0x19   :  { %v88_v13 = vadd.f32 %v87_v10, %v86_v8 }
  0x1a   :  { %175 = vrcp.f32 %v54_v11  ;;  %v66_v17 = vand.u32 2147483648, %v54_v11  ;;  %vm60_vm2 = vweird.f32 %v54_v11  ;;  %v64_v19 = vand.u32 2147483647, %v54_v11 }
  0x1b   :  { %v89_v14 = vadd.f32 %v88_v13, %v81_v12 }
  0x1c   :  { %v67_v22 = vor.u32 1.1754944e-38, %v66_v17  ;;  %vm65_vm5 = vcmp.eq.f32.partialorder %v64_v19, 8.507059e+37 }
  0x1d   :  { %91 = vst.msk [vmem:[#allocation8] sm:$0x1] %vm70_vm0, %v89_v14 }
  0x20   :  { %v176_v15 = vpop.eup %175 }
  0x21   :  { %v56_v16 = vmul.f32 %v176_v15, %v54_v11  ;;  %vm61_vm3 = vweird.f32 %v176_v15 }
  0x22   :  { %vm62_vm4 = vmor %vm60_vm2, %vm61_vm3 }
  0x23   :  { %v57_v18 = vsub.f32 1.0, %v56_v16 }
  0x24   :  { %v95_v21 = vld [vmem:[#allocation8] sm:$0x1] }
  0x25   :  { %v58_v20 = vmul.f32 %v176_v15, %v57_v18  ;;  %v96_v23 = vmul.f32 0.125, %v95_v21 }
  0x27   :  { %v59_v24 = vadd.f32 %v176_v15, %v58_v20  ;;  %97 = vst.msk [vmem:[#allocation8] sm:$0x1] %vm70_vm0, %v96_v23 }
  0x28   :  { %121 = dma.vmem_to_hbm [thread:$0]  %s117_s1, 16, %s119_s30, [#allocation9]  }
  0x29   :  { %v63_v25 = vsel %vm62_vm4, %v176_v15, %v59_v24 }
  0x2a   :  { %v68_v26 = vsel %vm65_vm5, %v67_v22, %v63_v25 }
  0x2b   :  { %71 = vst.msk [vmem:[#allocation11] sm:$0x1] %vm70_vm0, %v68_v26 }
  0x2c   :  { %143 = dma.vmem_to_hbm [thread:$0]  %s139_s7, 16, %s141_s10, [#allocation12]  }
  0x32   :  { %v73_v27 = vld [vmem:[#allocation11] sm:$0x1] }
  0x33   :  { %v98_v28 = vmul.f32 %v96_v23, %v73_v27  ;;  %v76_v29 = vperm.slane %v73_v27, 0 }
  0x35   :  { %99 = vst.msk [vmem:[#allocation10] sm:$0x1] %vm70_vm0, %v98_v28  ;;  %v78_v30 = vmul.f32 %v76_v29, %v74_v1 }
  0x36   :  { %132 = dma.vmem_to_hbm [thread:$0]  %s128_s11, 16, %s130_s13, [#allocation9]  }
  0x37   :  { %80 = vst.msk [vmem:[#allocation7] sm:$0xff] %vm79_vm1, %v78_v30 }
  0x38   :  { %110 = dma.vmem_to_hbm [thread:$0]  %s106_s15, 128, %s108_s18, [#allocation4]  }
  0x39   :  { %325 = dma.done.wait [#allocation4], 128  }
  0x3a   :  { %326 = vsyncadd [#allocation4], 4294967168 }
  0x3b   :  { %327 = dma.done.wait [#allocation9], 32  }
  0x3c   :  { %328 = vsyncadd [#allocation9], 4294967264 }
  0x3d   :  { %329 = dma.done.wait [#allocation12], 16  }
  0x3e   :  { %330 = vsyncadd [#allocation12], 4294967280 }
  0x3f   :  { %160 = vsyncpa [#allocation3], 1 }
  0x40   :  { %161 = vsyncpa [#allocation6], 1 }
  0x41   :  { %162 = vsyncpa [#allocation4], 1 }
  0x42   :  { %163 = vsyncpa [#allocation9], 1 }
  0x43   :  { %164 = vsyncpa [#allocation12], 1 }

</bundles_post_ra>
